<compile_context>
chip_gen: v6e
topology: v6e:2x2x1
jax: 0.10.0
libtpu: 0.0.40
codegen_flags: <defaults>
</compile_context>

<pallas_src>
import functools

import jax
import jax.numpy as jnp
from jax.experimental import pallas as pl
from jax.experimental.pallas import tpu as pltpu

D_IN = 28 * 28        # 784
HID = 100
HID_PAD = 128         # lane-dense hidden width (zero-padded, contributes exactly 0)
MAX_BT = 256          # batch tile: ~800 KiB f32 x tile, double-buffered ~1.6 MiB


def _round_up(n, m):
    return ((n + m - 1) // m) * m


def _pad_to(a, shape):
    return jnp.pad(a, [(0, t - s) for s, t in zip(a.shape, shape)])


def _mlp_kernel(x_ref, w1_ref, b1_ref, w2_ref, b2_ref, w3_ref, b3_ref, o_ref,
                *, compute_dtype):
    # x_ref:  (BT, 784)   streamed raw per grid step
    # w1_ref: (784, 128), b1_ref: (1, 128)   VMEM-resident (constant block index)
    # w2_ref: (128, 128), b2_ref: (1, 128)
    # w3_ref: (128, C),   b3_ref: (1, C)
    # o_ref:  (BT, C)     f32 logits
    x = x_ref[...].astype(compute_dtype)          # any narrowing cast happens in VMEM

    h1 = jnp.dot(x, w1_ref[...], preferred_element_type=jnp.float32) + b1_ref[...]
    h1 = jnp.maximum(h1, 0.0).astype(compute_dtype)

    h2 = jnp.dot(h1, w2_ref[...], preferred_element_type=jnp.float32) + b2_ref[...]
    h2 = jnp.maximum(h2, 0.0).astype(compute_dtype)

    out = jnp.dot(h2, w3_ref[...], preferred_element_type=jnp.float32) + b3_ref[...]
    o_ref[...] = out.astype(o_ref.dtype)


def student_net_forward(x, params, *, use_bf16=False):
    """x: (B, 1, 28, 28) or (B, 784).  Returns f32 logits (B, num_classes)."""
    w1, b1, w2, b2, w3, b3 = params
    num_classes = w3.shape[1]

    x2d = x.reshape(-1, D_IN)                     # x.view(-1, 784); no pad/cast pass over x
    if x2d.dtype != jnp.float32:
        x2d = x2d.astype(jnp.float32)
    B = x2d.shape[0]

    compute_dtype = jnp.bfloat16 if use_bf16 else jnp.float32

    # Weights/biases are tiny (<0.5 MiB total) -> padding/casting them is negligible.
    w1p = _pad_to(w1, (D_IN, HID_PAD)).astype(compute_dtype)
    w2p = _pad_to(w2, (HID_PAD, HID_PAD)).astype(compute_dtype)
    w3p = _pad_to(w3, (HID_PAD, num_classes)).astype(compute_dtype)
    b1p = _pad_to(b1.reshape(1, -1), (1, HID_PAD)).astype(jnp.float32)
    b2p = _pad_to(b2.reshape(1, -1), (1, HID_PAD)).astype(jnp.float32)
    b3p = b3.reshape(1, -1).astype(jnp.float32)

    # Batch tile: 256 for real batches, tiny batches use a single >=8-row block.
    bt = MAX_BT if B >= MAX_BT else max(8, _round_up(B, 8))
    grid = (pl.cdiv(B, bt),)                      # Pallas handles the remainder block

    weight_bytes = sum(int(a.size) * a.dtype.itemsize
                       for a in (w1p, w2p, w3p, b1p, b2p, b3p))
    cost = pl.CostEstimate(
        flops=2 * B * (D_IN * HID + HID * HID + HID * num_classes),
        transcendentals=0,
        bytes_accessed=B * D_IN * 4 + weight_bytes + B * num_classes * 4,
    )

    resident = lambda shp: pl.BlockSpec(shp, lambda i: (0, 0))
    kernel = functools.partial(_mlp_kernel, compute_dtype=compute_dtype)

    out = pl.pallas_call(
        kernel,
        out_shape=jax.ShapeDtypeStruct((B, num_classes), jnp.float32),
        grid=grid,
        in_specs=[
            pl.BlockSpec((bt, D_IN), lambda i: (i, 0)),   # stream raw x tiles
            resident(w1p.shape), resident(b1p.shape),      # weights stay VMEM-resident
            resident(w2p.shape), resident(b2p.shape),
            resident(w3p.shape), resident(b3p.shape),
        ],
        out_specs=pl.BlockSpec((bt, num_classes), lambda i: (i, 0)),
        compiler_params=pltpu.CompilerParams(
            dimension_semantics=("parallel",),             # megacore sharding on v7x
        ),
        cost_estimate=cost,
    )(x2d, w1p, b1p, w2p, b2p, w3p, b3p)

    return out


def init_params(key, num_classes=10):
    """nn.Linear-style U(-1/sqrt(fan_in), 1/sqrt(fan_in)); weights stored (in, out)."""
    dims = [(D_IN, HID), (HID, HID), (HID, num_classes)]
    params = []
    for fan_in, fan_out in dims:
        key, kw, kb = jax.random.split(key, 3)
        bound = 1.0 / (fan_in ** 0.5)
        w = jax.random.uniform(kw, (fan_in, fan_out), jnp.float32, -bound, bound)
        b = jax.random.uniform(kb, (fan_out,), jnp.float32, -bound, bound)
        params += [w, b]
    return tuple(params)


def _reference(x, params):
    w1, b1, w2, b2, w3, b3 = params
    xr = x.reshape(-1, D_IN)
    h = jnp.maximum(xr @ w1 + b1, 0.0)
    h = jnp.maximum(h @ w2 + b2, 0.0)
    return h @ w3 + b3


if __name__ == "__main__":
    key = jax.random.PRNGKey(0)
    key, kx, kx2 = jax.random.split(key, 3)
    params = init_params(key, num_classes=10)

    # Small MNIST-like batch, NCHW like PyTorch.
    x_small = jax.random.normal(kx, (2, 1, 28, 28), jnp.float32)
    logits = jax.block_until_ready(student_net_forward(x_small, params))
    assert logits.shape == (2, 10)
    assert jnp.allclose(logits, _reference(x_small, params), atol=1e-4, rtol=1e-4)

    # Non-multiple batch to exercise the multi-tile grid + Pallas remainder block.
    x_big = jax.random.normal(kx2, (515, 1, 28, 28), jnp.float32)
    logits_big = jax.block_until_ready(student_net_forward(x_big, params))
    assert logits_big.shape == (515, 10)
    assert jnp.allclose(logits_big, _reference(x_big, params), atol=1e-3, rtol=1e-3)

    # TODO(synk): the use_bf16 path rounds x/weights/activations to bf16 and will not
    # meet the f32 tolerances above; it trades accuracy for bandwidth when x is bf16.

    print("KERNEL_OK")
</pallas_src>

<mosaic_0001>
module attributes {stable_mosaic.version = 11 : i64} {
  func.func @_mlp_kernel(%arg0: i32, %arg1: memref<8x784xf32, #tpu.memory_space<vmem>>, %arg2: memref<784x128xf32, #tpu.memory_space<vmem>>, %arg3: memref<1x128xf32, #tpu.memory_space<vmem>>, %arg4: memref<128x128xf32, #tpu.memory_space<vmem>>, %arg5: memref<1x128xf32, #tpu.memory_space<vmem>>, %arg6: memref<128x10xf32, #tpu.memory_space<vmem>>, %arg7: memref<1x10xf32, #tpu.memory_space<vmem>>, %arg8: memref<8x10xf32, #tpu.memory_space<vmem>>) attributes {dimension_semantics = [#tpu.dimension_semantics<parallel>], iteration_bounds = array<i64: 1>, scalar_prefetch = 0 : i64, scratch_operands = 0 : i64, tpu.core_type = #tpu.core_type<tc>, window_params = [{transform_indices = @transform_0, window_bounds = array<i64: 8, 784>}, {pipeline_mode = #tpu.pipeline_mode<synchronous>, transform_indices = @transform_1, window_bounds = array<i64: 784, 128>}, {pipeline_mode = #tpu.pipeline_mode<synchronous>, transform_indices = @transform_2, window_bounds = array<i64: 1, 128>}, {pipeline_mode = #tpu.pipeline_mode<synchronous>, transform_indices = @transform_3, window_bounds = array<i64: 128, 128>}, {pipeline_mode = #tpu.pipeline_mode<synchronous>, transform_indices = @transform_4, window_bounds = array<i64: 1, 128>}, {pipeline_mode = #tpu.pipeline_mode<synchronous>, transform_indices = @transform_5, window_bounds = array<i64: 128, 10>}, {pipeline_mode = #tpu.pipeline_mode<synchronous>, transform_indices = @transform_6, window_bounds = array<i64: 1, 10>}, {transform_indices = @transform_7, window_bounds = array<i64: 8, 10>}]} {
    %c0 = arith.constant 0 : index
    %c0_0 = arith.constant 0 : index
    %0 = vector.load %arg1[%c0, %c0_0] : memref<8x784xf32, #tpu.memory_space<vmem>>, vector<8x784xf32>
    %c0_1 = arith.constant 0 : index
    %c0_2 = arith.constant 0 : index
    %1 = vector.load %arg2[%c0_1, %c0_2] : memref<784x128xf32, #tpu.memory_space<vmem>>, vector<784x128xf32>
    %cst = arith.constant dense<0.000000e+00> : vector<8x128xf32>
    %2 = tpu.matmul %0, %1, %cst {dimension_numbers = #tpu.dot_dimension_numbers<[1], [0], [0], [1], [0, 0, 1, 1], [], []>} : vector<8x784xf32>, vector<784x128xf32>, vector<8x128xf32> -> vector<8x128xf32>
    %c0_3 = arith.constant 0 : index
    %c0_4 = arith.constant 0 : index
    %3 = vector.load %arg3[%c0_3, %c0_4] : memref<1x128xf32, #tpu.memory_space<vmem>>, vector<1x128xf32>
    %4 = vector.broadcast %3 : vector<1x128xf32> to vector<8x128xf32>
    %5 = arith.addf %2, %4 : vector<8x128xf32>
    %cst_5 = arith.constant 0.000000e+00 : f32
    %6 = vector.broadcast %cst_5 : f32 to vector<8x128xf32>
    %7 = arith.maximumf %5, %6 : vector<8x128xf32>
    %c0_6 = arith.constant 0 : index
    %c0_7 = arith.constant 0 : index
    %8 = vector.load %arg4[%c0_6, %c0_7] : memref<128x128xf32, #tpu.memory_space<vmem>>, vector<128x128xf32>
    %cst_8 = arith.constant dense<0.000000e+00> : vector<8x128xf32>
    %9 = tpu.matmul %7, %8, %cst_8 {dimension_numbers = #tpu.dot_dimension_numbers<[1], [0], [0], [1], [0, 0, 1, 1], [], []>} : vector<8x128xf32>, vector<128x128xf32>, vector<8x128xf32> -> vector<8x128xf32>
    %c0_9 = arith.constant 0 : index
    %c0_10 = arith.constant 0 : index
    %10 = vector.load %arg5[%c0_9, %c0_10] : memref<1x128xf32, #tpu.memory_space<vmem>>, vector<1x128xf32>
    %11 = vector.broadcast %10 : vector<1x128xf32> to vector<8x128xf32>
    %12 = arith.addf %9, %11 : vector<8x128xf32>
    %cst_11 = arith.constant 0.000000e+00 : f32
    %13 = vector.broadcast %cst_11 : f32 to vector<8x128xf32>
    %14 = arith.maximumf %12, %13 : vector<8x128xf32>
    %c0_12 = arith.constant 0 : index
    %c0_13 = arith.constant 0 : index
    %15 = vector.load %arg6[%c0_12, %c0_13] : memref<128x10xf32, #tpu.memory_space<vmem>>, vector<128x10xf32>
    %cst_14 = arith.constant dense<0.000000e+00> : vector<8x10xf32>
    %16 = tpu.matmul %14, %15, %cst_14 {dimension_numbers = #tpu.dot_dimension_numbers<[1], [0], [0], [1], [0, 0, 1, 1], [], []>} : vector<8x128xf32>, vector<128x10xf32>, vector<8x10xf32> -> vector<8x10xf32>
    %c0_15 = arith.constant 0 : index
    %c0_16 = arith.constant 0 : index
    %17 = vector.load %arg7[%c0_15, %c0_16] : memref<1x10xf32, #tpu.memory_space<vmem>>, vector<1x10xf32>
    %18 = vector.broadcast %17 : vector<1x10xf32> to vector<8x10xf32>
    %19 = arith.addf %16, %18 : vector<8x10xf32>
    %c0_17 = arith.constant 0 : index
    %c0_18 = arith.constant 0 : index
    %20 = vector.load %arg8[%c0_17, %c0_18] : memref<8x10xf32, #tpu.memory_space<vmem>>, vector<8x10xf32>
    tpu.vector_store %arg8[%c0_17, %c0_18], %19 {strides = array<i32>} : memref<8x10xf32, #tpu.memory_space<vmem>>, vector<8x10xf32>,
    return
  }
  func.func @transform_0(%arg0: i32) -> (i32, i32) {
    %c0_i32 = arith.constant 0 : i32
    %c0_i32_0 = arith.constant 0 : i32
    return %arg0, %c0_i32 : i32, i32
  }
  func.func @transform_1(%arg0: i32) -> (i32, i32) {
    %c0_i32 = arith.constant 0 : i32
    %c0_i32_0 = arith.constant 0 : i32
    %c0_i32_1 = arith.constant 0 : i32
    return %c0_i32, %c0_i32_0 : i32, i32
  }
  func.func @transform_2(%arg0: i32) -> (i32, i32) {
    %c0_i32 = arith.constant 0 : i32
    %c0_i32_0 = arith.constant 0 : i32
    %c0_i32_1 = arith.constant 0 : i32
    return %c0_i32, %c0_i32_0 : i32, i32
  }
  func.func @transform_3(%arg0: i32) -> (i32, i32) {
    %c0_i32 = arith.constant 0 : i32
    %c0_i32_0 = arith.constant 0 : i32
    %c0_i32_1 = arith.constant 0 : i32
    return %c0_i32, %c0_i32_0 : i32, i32
  }
  func.func @transform_4(%arg0: i32) -> (i32, i32) {
    %c0_i32 = arith.constant 0 : i32
    %c0_i32_0 = arith.constant 0 : i32
    %c0_i32_1 = arith.constant 0 : i32
    return %c0_i32, %c0_i32_0 : i32, i32
  }
  func.func @transform_5(%arg0: i32) -> (i32, i32) {
    %c0_i32 = arith.constant 0 : i32
    %c0_i32_0 = arith.constant 0 : i32
    %c0_i32_1 = arith.constant 0 : i32
    return %c0_i32, %c0_i32_0 : i32, i32
  }
  func.func @transform_6(%arg0: i32) -> (i32, i32) {
    %c0_i32 = arith.constant 0 : i32
    %c0_i32_0 = arith.constant 0 : i32
    %c0_i32_1 = arith.constant 0 : i32
    return %c0_i32, %c0_i32_0 : i32, i32
  }
  func.func @transform_7(%arg0: i32) -> (i32, i32) {
    %c0_i32 = arith.constant 0 : i32
    %c0_i32_0 = arith.constant 0 : i32
    return %arg0, %c0_i32 : i32, i32
  }
}

</mosaic_0001>

<bundles_post_ra>
// kernel: tpu_custom_call.1
= control target key start
LH: loop header
LB: loop body
LE: loop exit
PB: predicated region body
PF: predicated region fallthrough
CT: control target
= control target key end

     0   :  { %12 = vsyncpa [#allocation3], 0  ;;  %s1259_s0 = inlined_call_operand.vmem [shape: f32[2,784], index: 0, kind: input, shape index: {}]   ;;  %s1260_s1 = inlined_call_operand.hbm [shape: f32[784,128], index: 1, kind: input, shape index: {}]   ;;  %s1261_s2 = inlined_call_operand.vmem [shape: f32[1,128], index: 2, kind: input, shape index: {}]   ;;  %s1262_s3 = inlined_call_operand.vmem [shape: f32[128,128], index: 3, kind: input, shape index: {}]   ;;  %s1263_s4 = inlined_call_operand.vmem [shape: f32[1,128], index: 4, kind: input, shape index: {}]   ;;  %s1264_s5 = inlined_call_operand.vmem [shape: f32[128,10], index: 5, kind: input, shape index: {}]   ;;  %s1265_s6 = inlined_call_operand.vmem [shape: f32[1,10], index: 6, kind: input, shape index: {}]   ;;  %s1266_s7 = inlined_call_operand.hbm [shape: f32[2,10], index: 7, kind: output, shape index: {}]  }
   0x1   :  { %13 = vsyncpa [#allocation4], 0  ;;  %s1017_s24 = smov [#allocation2]  }
   0x2   :  { %s21_s25 = sshll.u32 %s1017_s24, 4  ;;  %s22_s25 = int_to_ptr.vmem [resolvable:$true] %s21_s25 }
   0x3   :  { %s981_s26 = scalar_lea.vmem %s22_s25, 12544  ;;  %p986_p1 = scmp.lt.s32.totalorder %s22_s25, %s22_s25 }
   0x4   :  { %p982_p0 = scmp.ne.s32.totalorder %s22_s25, %s981_s26  ;;  %p987_p2 = scmp.lt.s32.totalorder %s981_s26, %s981_s26 }
   0x6   :  { %p988_p3 = por %p987_p2, %p986_p1 }
   0x8   :  { %p989_p4 = pnand %p988_p3, %p982_p0 }
   0xa   :  { %992 = shalt.err (!%p989_p4)
}
   0xb   :  { %s1018_s27 = smov 128   ;;  %s1019_s28 = smov 8  }
   0xc   :  { %27 = dma.hbm_to_vmem [thread:$0]  %s1260_s1, 12544, %s22_s25, [#allocation3], %s1018_s27, %s1018_s27, %s1019_s28  }
   0xd   :  { %1013 = dma.done.wait [#allocation3], 12544  }
   0xe   :  { %1014 = vsyncadd [#allocation3], 4294954752  ;;  %v80_v0 = vld [vmem:[#allocation2 + $0xf8] sm:$0xff]  ;;  %v79_v2 = vld [vmem:[#allocation2 + $0xf0] sm:$0xff]  ;;  %v1020_v27 = vmov 1983009808   ;;  %v169_v29 = vlaneseq }
   0xf   :  { %v64_v1 = vld [vmem:[#allocation2 + $0x78] sm:$0xff]  ;;  %733 = vmatprep.subr.mxu0 %v80_v0  ;;  %v63_v4 = vld [vmem:[#allocation2 + $0x70] sm:$0xff]  ;;  %v78_v6 = vld [vmem:[#allocation2 + $0xe8] sm:$0xff]  ;;  %v167_v28 = vunpack.c.l.s4 %v1020_v27  ;;  %vm1022_vm0 = vmmov 0   ;;  %vm239_vm1 = vcmask 130048   ;;  %vm710_vm2 = vcmask 80896  }
  0x10   :  { %v112_v3 = vld [vmem:[#allocation2 + $0x1f8] sm:$0xff]  ;;  %734 = vmatpush3.msra.mxu0 %v64_v1  ;;  %v111_v7 = vld [vmem:[#allocation2 + $0x1f0] sm:$0xff]  ;;  %v62_v8 = vld [vmem:[#allocation2 + $0x68] sm:$0xff]  ;;  %v170_v39 = vshrl.u32 %v169_v29, 7 }
  0x11   :  { %v96_v5 = vld [vmem:[#allocation2 + $0x178] sm:$0xff]  ;;  %768 = vmatprep.subr.mxu1 %v112_v3  ;;  %735 = vmatprep.subr.mxu0 %v79_v2  ;;  %v95_v9 = vld [vmem:[#allocation2 + $0x170] sm:$0xff]  ;;  %v110_v10 = vld [vmem:[#allocation2 + $0x1e8] sm:$0xff]  ;;  %v168_v38 = vunpack.c.0.s8 %v167_v28 }
  0x12   :  { %769 = vmatpush3.msra.mxu1 %v96_v5  ;;  %736 = vmatpush3.msra.mxu0 %v63_v4  ;;  %v77_v11 = vld [vmem:[#allocation2 + $0xe0] sm:$0xff]  ;;  %v94_v12 = vld [vmem:[#allocation2 + $0x168] sm:$0xff]  ;;  %v76_v15 = vld [vmem:[#allocation2 + $0xd8] sm:$0xff] }
  0x13   :  { %770 = vmatprep.subr.mxu1 %v111_v7  ;;  %737 = vmatprep.subr.mxu0 %v78_v6  ;;  %v61_v13 = vld [vmem:[#allocation2 + $0x60] sm:$0xff]  ;;  %v60_v17 = vld [vmem:[#allocation2 + $0x58] sm:$0xff]  ;;  %v75_v19 = vld [vmem:[#allocation2 + $0xd0] sm:$0xff]  ;;  %v1069_v51 = vsub.s32 %v168_v38, %v170_v39 }
  0x14   :  { %771 = vmatpush3.msra.mxu1 %v95_v9  ;;  %v109_v14 = vld [vmem:[#allocation2 + $0x1e0] sm:$0xff]  ;;  %738 = vmatpush3.msra.mxu0 %v62_v8  ;;  %v108_v18 = vld [vmem:[#allocation2 + $0x1d8] sm:$0xff]  ;;  %v59_v21 = vld [vmem:[#allocation2 + $0x50] sm:$0xff] }
  0x15   :  { %772 = vmatprep.subr.mxu1 %v110_v10  ;;  %v93_v16 = vld [vmem:[#allocation2 + $0x160] sm:$0xff]  ;;  %739 = vmatprep.subr.mxu0 %v77_v11  ;;  %v92_v20 = vld [vmem:[#allocation2 + $0x158] sm:$0xff]  ;;  %v107_v22 = vld [vmem:[#allocation2 + $0x1d0] sm:$0xff] }
  0x16   :  { %773 = vmatpush3.msra.mxu1 %v94_v12  ;;  %740 = vmatpush3.msra.mxu0 %v61_v13  ;;  %v74_v23 = vld [vmem:[#allocation2 + $0xc8] sm:$0xff]  ;;  %v91_v24 = vld [vmem:[#allocation2 + $0x150] sm:$0xff]  ;;  %v73_v30 = vld [vmem:[#allocation2 + $0xc0] sm:$0xff] }
  0x17   :  { %774 = vmatprep.subr.mxu1 %v109_v14  ;;  %741 = vmatprep.subr.mxu0 %v76_v15  ;;  %v58_v25 = vld [vmem:[#allocation2 + $0x48] sm:$0xff]  ;;  %v57_v32 = vld [vmem:[#allocation2 + $0x40] sm:$0xff]  ;;  %v72_v34 = vld [vmem:[#allocation2 + $0xb8] sm:$0xff] }
  0x18   :  { %775 = vmatpush3.msra.mxu1 %v93_v16  ;;  %742 = vmatpush3.msra.mxu0 %v60_v17  ;;  %v106_v26 = vld [vmem:[#allocation2 + $0x1c8] sm:$0xff]  ;;  %v105_v33 = vld [vmem:[#allocation2 + $0x1c0] sm:$0xff]  ;;  %v56_v36 = vld [vmem:[#allocation2 + $0x38] sm:$0xff] }
  0x19   :  { %776 = vmatprep.subr.mxu1 %v108_v18  ;;  %743 = vmatprep.subr.mxu0 %v75_v19  ;;  %v90_v31 = vld [vmem:[#allocation2 + $0x148] sm:$0xff]  ;;  %v89_v35 = vld [vmem:[#allocation2 + $0x140] sm:$0xff]  ;;  %v104_v37 = vld [vmem:[#allocation2 + $0x1b8] sm:$0xff] }
  0x1a   :  { %777 = vmatpush3.msra.mxu1 %v92_v20  ;;  %744 = vmatpush3.msra.mxu0 %v59_v21  ;;  %v71_v40 = vld [vmem:[#allocation2 + $0xb0] sm:$0xff]  ;;  %v88_v41 = vld [vmem:[#allocation2 + $0x138] sm:$0xff]  ;;  %v70_v43 = vld [vmem:[#allocation2 + $0xa8] sm:$0xff] }
  0x1b   :  { %778 = vmatprep.subr.mxu1 %v107_v22  ;;  %745 = vmatprep.subr.mxu0 %v74_v23  ;;  %v55_v42 = vld [vmem:[#allocation2 + $0x30] sm:$0xff]  ;;  %v54_v45 = vld [vmem:[#allocation2 + $0x28] sm:$0xff]  ;;  %v69_v47 = vld [vmem:[#allocation2 + $0xa0] sm:$0xff] }
  0x1c   :  { %779 = vmatpush3.msra.mxu1 %v91_v24  ;;  %746 = vmatpush3.msra.mxu0 %v58_v25  ;;  %v103_v44 = vld [vmem:[#allocation2 + $0x1b0] sm:$0xff]  ;;  %v102_v48 = vld [vmem:[#allocation2 + $0x1a8] sm:$0xff]  ;;  %v53_v49 = vld [vmem:[#allocation2 + $0x20] sm:$0xff] }
  0x1d   :  { %780 = vmatprep.subr.mxu1 %v106_v26  ;;  %747 = vmatprep.subr.mxu0 %v73_v30  ;;  %v87_v46 = vld [vmem:[#allocation2 + $0x130] sm:$0xff]  ;;  %v86_v50 = vld [vmem:[#allocation2 + $0x128] sm:$0xff]  ;;  %v101_v52 = vld [vmem:[#allocation2 + $0x1a0] sm:$0xff]  ;;  %v1021_v30 = vmov 0.0  }
  0x1e   :  { %781 = vmatpush3.msra.mxu1 %v90_v31  ;;  %748 = vmatpush3.msra.mxu0 %v57_v32  ;;  %v961_v53 = vld [vmem:[%s1259_s0] ss:$14 sps:$4 sm:$0xff]   ;;  %v68_v54 = vld [vmem:[#allocation2 + $0x98] sm:$0xff]  ;;  %v965_v60 = vld [vmem:[%s1259_s0 + $0x4] ss:$14 sps:$4 sm:$0xff]  }
  0x1f   :  { %782 = vmatprep.subr.mxu1 %v105_v33  ;;  %749 = vmatprep.subr.mxu0 %v72_v34  ;;  %v85_v55 = vld [vmem:[#allocation2 + $0x120] sm:$0xff]  ;;  %v963_v56 = vld [vmem:[%s1259_s0 + $0x1c] ss:$14 sps:$4 sm:$0xff]   ;;  %v172_v59 = vrot.slane %v961_v53, %v1069_v51  ;;  %v67_v61 = vld [vmem:[#allocation2 + $0x90] sm:$0xff]  ;;  %v179_v8 = vrot.slane %v965_v60, %v1069_v51 }
  0x20   :  { %783 = vmatpush3.msra.mxu1 %v89_v35  ;;  %750 = vmatpush3.msra.mxu0 %v56_v36  ;;  %v52_v57 = vld [vmem:[#allocation2 + $0x18] sm:$0xff]  ;;  %v186_v63 = vrot.slane %v963_v56, %v1069_v51  ;;  %v966_v0 = vld [vmem:[%s1259_s0 + $0x20] ss:$14 sps:$4 sm:$0xff]   ;;  %v970_v28 = vld [vmem:[%s1259_s0 + $0x24] ss:$14 sps:$4 sm:$0xff]  }
  0x21   :  { %784 = vmatprep.subr.mxu1 %v104_v37  ;;  %751 = vmatprep.subr.mxu0 %v71_v40  ;;  %v100_v58 = vld [vmem:[#allocation2 + $0x198] sm:$0xff]  ;;  %v51_v1 = vld [vmem:[#allocation2 + $0x10] sm:$0xff]  ;;  %v66_v3 = vld [vmem:[#allocation2 + $0x88] sm:$0xff]  ;;  %v193_v9 = vrot.slane %v966_v0, %v1069_v51  ;;  %v1105_v36 = vrot.slane %v970_v28, %v1069_v51 }
  0x22   :  { %785 = vmatpush3.msra.mxu1 %v88_v41  ;;  %752 = vmatpush3.msra.mxu0 %v55_v42  ;;  %v84_v62 = vld [vmem:[#allocation2 + $0x118] sm:$0xff]  ;;  %v99_v2 = vld [vmem:[#allocation2 + $0x190] sm:$0xff]  ;;  %v50_v5 = vld [vmem:[#allocation2 + $0x8] sm:$0xff]  ;;  %v195_v7 = vcombine.high %v172_v59, %v186_v63  ;;  %v194_v13 = vcombine.low %v172_v59, %v186_v63 }
  0x23   :  { %786 = vmatprep.subr.mxu1 %v103_v44  ;;  %753 = vmatprep.subr.mxu0 %v70_v43  ;;  %v83_v4 = vld [vmem:[#allocation2 + $0x110] sm:$0xff]  ;;  %v98_v6 = vld [vmem:[#allocation2 + $0x188] sm:$0xff]  ;;  %v65_v10 = vld [vmem:[#allocation2 + $0x80] sm:$0xff]  ;;  %v197_v17 = vcombine.high %v179_v8, %v193_v9  ;;  %v196_v19 = vcombine.low %v179_v8, %v193_v9 }
  0x24   :  { %787 = vmatpush3.msra.mxu1 %v87_v46  ;;  %754 = vmatpush3.msra.mxu0 %v54_v45  ;;  %v49_v11 = vld [vmem:[#allocation2] sm:$0xff]  ;;  %v82_v12 = vld [vmem:[#allocation2 + $0x108] sm:$0xff]  ;;  %v144_v15 = vld [vmem:[#allocation2 + $0x2f8] sm:$0xff] }
  0x25   :  { %788 = vmatprep.subr.mxu1 %v102_v48  ;;  %755 = vmatprep.subr.mxu0 %v69_v47  ;;  %v97_v14 = vld [vmem:[#allocation2 + $0x180] sm:$0xff]  ;;  %v128_v18 = vld [vmem:[#allocation2 + $0x278] sm:$0xff]  ;;  %v143_v20 = vld [vmem:[#allocation2 + $0x2f0] sm:$0xff] }
  0x26   :  { %789 = vmatpush3.msra.mxu1 %v86_v50  ;;  %756 = vmatpush3.msra.mxu0 %v53_v49  ;;  %v81_v16 = vld [vmem:[#allocation2 + $0x100] sm:$0xff]  ;;  %v127_v21 = vld [vmem:[#allocation2 + $0x270] sm:$0xff]  ;;  %v142_v22 = vld [vmem:[#allocation2 + $0x2e8] sm:$0xff] }
  0x27   :  { %790 = vmatprep.subr.mxu1 %v101_v52  ;;  %757 = vmatprep.subr.mxu0 %v68_v54  ;;  %v126_v23 = vld [vmem:[#allocation2 + $0x268] sm:$0xff]  ;;  %v141_v24 = vld [vmem:[#allocation2 + $0x2e0] sm:$0xff]  ;;  %v140_v35 = vld [vmem:[#allocation2 + $0x2d8] sm:$0xff] }
  0x28   :  { %791 = vmatpush3.msra.mxu1 %v85_v55  ;;  %758 = vmatpush3.msra.mxu0 %v52_v57  ;;  %v967_v25 = vld [vmem:[%s1259_s0 + $0x8] ss:$14 sps:$4 sm:$0xff]   ;;  %v969_v26 = vld [vmem:[%s1259_s0 + $0xc] ss:$14 sps:$4 sm:$0x33]   ;;  %v145_v31 = vld [vmem:[#allocation2 + $0x300] sm:$0xff] }
  0x29   :  { %792 = vmatprep.subr.mxu1 %v100_v58  ;;  %759 = vmatprep.subr.mxu0 %v67_v61  ;;  %v146_v27 = vld [vmem:[#allocation2 + $0x308] sm:$0xff]  ;;  %v125_v32 = vld [vmem:[#allocation2 + $0x260] sm:$0xff]  ;;  %v1101_v33 = vrot.slane %v967_v25, %v1069_v51  ;;  %v215_v34 = vrot.slane %v969_v26, %v1069_v51  ;;  %v124_v38 = vld [vmem:[#allocation2 + $0x258] sm:$0xff] }
  0x2a   :  { %793 = vmatpush3.msra.mxu1 %v84_v62  ;;  %760 = vmatpush3.msra.mxu0 %v51_v1  ;;  %v972_v29 = vld [vmem:[%s1259_s0 + $0x28] ss:$14 sps:$4 sm:$0x33]   ;;  %v137_v45 = vld [vmem:[#allocation2 + $0x2c0] sm:$0xff]  ;;  %v136_v47 = vld [vmem:[#allocation2 + $0x2b8] sm:$0xff] }
  0x2b   :  { %794 = vmatprep.subr.mxu1 %v99_v2  ;;  %761 = vmatprep.subr.mxu0 %v66_v3  ;;  %v229_v37 = vrot.slane %v972_v29, %v1069_v51  ;;  %v139_v39 = vld [vmem:[#allocation2 + $0x2d0] sm:$0xff]  ;;  %v231_v40 = vcombine.high %v1101_v33, %v1105_v36  ;;  %v138_v43 = vld [vmem:[#allocation2 + $0x2c8] sm:$0xff]  ;;  %v121_v46 = vld [vmem:[#allocation2 + $0x240] sm:$0xff]  ;;  %v230_v63 = vcombine.low %v1101_v33, %v1105_v36 }
  0x2c   :  { %795 = vmatpush3.msra.mxu1 %v83_v4  ;;  %762 = vmatpush3.msra.mxu0 %v50_v5  ;;  %v123_v42 = vld [vmem:[#allocation2 + $0x250] sm:$0xff]  ;;  %v122_v44 = vld [vmem:[#allocation2 + $0x248] sm:$0xff]  ;;  %v120_v48 = vld [vmem:[#allocation2 + $0x238] sm:$0xff] }
  0x2d   :  { %796 = vmatprep.subr.mxu1 %v98_v6  ;;  %763 = vmatprep.subr.mxu0 %v65_v10  ;;  %v232_v41 = vcombine.low %v215_v34, %v229_v37  ;;  %v135_v49 = vld [vmem:[#allocation2 + $0x2b0] sm:$0xff]  ;;  %v134_v51 = vld [vmem:[#allocation2 + $0x2a8] sm:$0xff]  ;;  %v133_v53 = vld [vmem:[#allocation2 + $0x2a0] sm:$0xff] }
  0x2e   :  { %306 = vmatprep.mubr.f32.mxu0 %v195_v7  ;;  %764 = vmatpush3.msra.mxu0 %v49_v11  ;;  %v119_v50 = vld [vmem:[#allocation2 + $0x230] sm:$0xff]  ;;  %v118_v52 = vld [vmem:[#allocation2 + $0x228] sm:$0xff]  ;;  %v117_v54 = vld [vmem:[#allocation2 + $0x220] sm:$0xff] }
  0x2f   :  { %797 = vmatpush3.msra.mxu1 %v82_v12  ;;  %307 = vmatmul.mubr.f32.vlgmr.msra.gmra.mxu0 %v194_v13  ;;  %v132_v55 = vld [vmem:[#allocation2 + $0x298] sm:$0xff]  ;;  %v131_v57 = vld [vmem:[#allocation2 + $0x290] sm:$0xff]  ;;  %v130_v59 = vld [vmem:[#allocation2 + $0x288] sm:$0xff] }
  0x30   :  { %798 = vmatprep.subr.mxu1 %v97_v14  ;;  %803 = vmatprep.subr.mxu0 %v144_v15  ;;  %v116_v56 = vld [vmem:[#allocation2 + $0x218] sm:$0xff]  ;;  %v115_v58 = vld [vmem:[#allocation2 + $0x210] sm:$0xff]  ;;  %v114_v60 = vld [vmem:[#allocation2 + $0x208] sm:$0xff] }
  0x31   :  { %799 = vmatpush3.msra.mxu1 %v81_v16  ;;  %376 = vmatprep.mubr.f32.mxu1 %v197_v17  ;;  %v129_v61 = vld [vmem:[#allocation2 + $0x280] sm:$0xff]  ;;  %v538_v0 = vld [vmem:[%s1262_s3 + $0x78] sm:$0xff]  ;;  %v537_v1 = vld [vmem:[%s1262_s3 + $0x70] sm:$0xff] }
  0x32   :  { %804 = vmatpush3.msra.mxu0 %v128_v18  ;;  %377 = vmatmul.mubr.f32.vlgmr.msra.gmra.mxu1 %v196_v19  ;;  %v113_v62 = vld [vmem:[#allocation2 + $0x200] sm:$0xff]  ;;  %v536_v2 = vld [vmem:[%s1262_s3 + $0x68] sm:$0xff]  ;;  %v534_v4 = vld [vmem:[%s1262_s3 + $0x58] sm:$0xff] }
  0x33   :  { %805 = vmatprep.subr.mxu0 %v143_v20  ;;  %875 = vmatprep.subr.mxu1 %v1021_v30  ;;  %v535_v3 = vld [vmem:[%s1262_s3 + $0x60] sm:$0xff]  ;;  %v533_v5 = vld [vmem:[%s1262_s3 + $0x50] sm:$0xff]  ;;  %v532_v6 = vld [vmem:[%s1262_s3 + $0x48] sm:$0xff] }
  0x34   :  { %806 = vmatpush3.msra.mxu0 %v127_v21  ;;  %876 = vmatpush3.msra.mxu1 %v146_v27  ;;  %v531_v7 = vld [vmem:[%s1262_s3 + $0x40] sm:$0xff]  ;;  %v530_v8 = vld [vmem:[%s1262_s3 + $0x38] sm:$0xff]  ;;  %v529_v9 = vld [vmem:[%s1262_s3 + $0x30] sm:$0xff] }
  0x35   :  { %807 = vmatprep.subr.mxu0 %v142_v22  ;;  %877 = vmatprep.subr.mxu1 %v1021_v30  ;;  %v528_v10 = vld [vmem:[%s1262_s3 + $0x28] sm:$0xff]  ;;  %v527_v11 = vld [vmem:[%s1262_s3 + $0x20] sm:$0xff]  ;;  %v526_v12 = vld [vmem:[%s1262_s3 + $0x18] sm:$0xff] }
  0x36   :  { %808 = vmatpush3.msra.mxu0 %v126_v23  ;;  %878 = vmatpush3.msra.mxu1 %v145_v31  ;;  %v525_v13 = vld [vmem:[%s1262_s3 + $0x10] sm:$0xff]  ;;  %v524_v14 = vld [vmem:[%s1262_s3 + $0x8] sm:$0xff]  ;;  %v523_v15 = vld [vmem:[%s1262_s3] sm:$0xff] }
  0x37   :  { %809 = vmatprep.subr.mxu0 %v141_v24  ;;  %879 = vmatprep.mubr.msk.f32.mxu1 %vm1022_vm0, %v1021_v30  ;;  %v632_v16 = vld [vmem:[%s1264_s5 + $0x78] sm:$0xff]  ;;  %v631_v17 = vld [vmem:[%s1264_s5 + $0x70] sm:$0xff]  ;;  %v630_v18 = vld [vmem:[%s1264_s5 + $0x68] sm:$0xff] }
  0x38   :  { %810 = vmatpush3.msra.mxu0 %v125_v32  ;;  %882 = vmatprep.subr.mxu1 %v1021_v30  ;;  %v629_v19 = vld [vmem:[%s1264_s5 + $0x60] sm:$0xff]  ;;  %v628_v20 = vld [vmem:[%s1264_s5 + $0x58] sm:$0xff]  ;;  %v627_v21 = vld [vmem:[%s1264_s5 + $0x50] sm:$0xff] }
  0x39   :  { %811 = vmatprep.subr.mxu0 %v140_v35  ;;  %446 = vmatprep.mubr.f32.mxu0 %v231_v40  ;;  %v626_v22 = vld [vmem:[%s1264_s5 + $0x48] sm:$0xff]  ;;  %v625_v23 = vld [vmem:[%s1264_s5 + $0x40] sm:$0xff]  ;;  %v624_v24 = vld [vmem:[%s1264_s5 + $0x38] sm:$0xff] }
  0x3a   :  { %812 = vmatpush3.msra.mxu0 %v124_v38  ;;  %880 = vmatmul.mubr.msk.f32.vlgmr.msra.gmra.mxu1 %vm239_vm1, %v232_v41  ;;  %v623_v25 = vld [vmem:[%s1264_s5 + $0x30] sm:$0xff]  ;;  %v622_v26 = vld [vmem:[%s1264_s5 + $0x28] sm:$0xff]  ;;  %v621_v27 = vld [vmem:[%s1264_s5 + $0x20] sm:$0xff] }
  0x3b   :  { %813 = vmatprep.subr.mxu0 %v139_v39  ;;  %914 = vmatprep.mubr.msk.f32.mxu1 %vm1022_vm0, %v1021_v30  ;;  %v620_v28 = vld [vmem:[%s1264_s5 + $0x18] sm:$0xff]  ;;  %v729_v37 = vld [vmem:[%s1261_s2] ss:$0 sm:$0xff] }
  0x3c   :  { %814 = vmatpush3.msra.mxu0 %v123_v42  ;;  %883 = vmatpush3.msra.mxu1 %v538_v0 }
  0x3d   :  { %815 = vmatprep.subr.mxu0 %v138_v43  ;;  %884 = vmatprep.subr.mxu1 %v1021_v30 }
  0x3e   :  { %816 = vmatpush3.msra.mxu0 %v122_v44  ;;  %885 = vmatpush3.msra.mxu1 %v537_v1 }
  0x3f   :  { %817 = vmatprep.subr.mxu0 %v137_v45  ;;  %886 = vmatprep.subr.mxu1 %v1021_v30 }
  0x40   :  { %818 = vmatpush3.msra.mxu0 %v121_v46  ;;  %887 = vmatpush3.msra.mxu1 %v536_v2 }
  0x41   :  { %819 = vmatprep.subr.mxu0 %v136_v47  ;;  %888 = vmatprep.subr.mxu1 %v1021_v30  ;;  %v619_v47 = vld [vmem:[%s1264_s5 + $0x10] sm:$0xff] }
  0x42   :  { %820 = vmatpush3.msra.mxu0 %v120_v48  ;;  %889 = vmatpush3.msra.mxu1 %v535_v3  ;;  %v618_v48 = vld [vmem:[%s1264_s5 + $0x8] sm:$0xff] }
  0x43   :  { %821 = vmatprep.subr.mxu0 %v135_v49  ;;  %890 = vmatprep.subr.mxu1 %v1021_v30  ;;  %v617_v49 = vld [vmem:[%s1264_s5] sm:$0xff] }
  0x44   :  { %822 = vmatpush3.msra.mxu0 %v119_v50  ;;  %891 = vmatpush3.msra.mxu1 %v534_v4  ;;  %v731_v50 = vld [vmem:[%s1263_s4] ss:$0 sm:$0xff] }
  0x45   :  { %823 = vmatprep.subr.mxu0 %v134_v51  ;;  %892 = vmatprep.subr.mxu1 %v1021_v30 }
  0x46   :  { %824 = vmatpush3.msra.mxu0 %v118_v52  ;;  %893 = vmatpush3.msra.mxu1 %v533_v5 }
  0x47   :  { %825 = vmatprep.subr.mxu0 %v133_v53  ;;  %894 = vmatprep.subr.mxu1 %v1021_v30 }
  0x48   :  { %826 = vmatpush3.msra.mxu0 %v117_v54  ;;  %895 = vmatpush3.msra.mxu1 %v532_v6 }
  0x49   :  { %827 = vmatprep.subr.mxu0 %v132_v55  ;;  %896 = vmatprep.subr.mxu1 %v1021_v30  ;;  %v732_v55 = vld [vmem:[%s1265_s6] ss:$0 sm:$0xff] }
  0x4a   :  { %828 = vmatpush3.msra.mxu0 %v116_v56  ;;  %897 = vmatpush3.msra.mxu1 %v531_v7 }
  0x4b   :  { %829 = vmatprep.subr.mxu0 %v131_v57  ;;  %898 = vmatprep.subr.mxu1 %v1021_v30 }
  0x4c   :  { %830 = vmatpush3.msra.mxu0 %v115_v58  ;;  %899 = vmatpush3.msra.mxu1 %v530_v8 }
  0x4d   :  { %831 = vmatprep.subr.mxu0 %v130_v59  ;;  %900 = vmatprep.subr.mxu1 %v1021_v30 }
  0x4e   :  { %832 = vmatpush3.msra.mxu0 %v114_v60  ;;  %901 = vmatpush3.msra.mxu1 %v529_v9 }
  0x4f   :  { %833 = vmatprep.subr.mxu0 %v129_v61  ;;  %902 = vmatprep.subr.mxu1 %v1021_v30 }
  0x50   :  { %834 = vmatpush3.msra.mxu0 %v113_v62  ;;  %903 = vmatpush3.msra.mxu1 %v528_v10 }
  0x51   :  { %447 = vmatmul.mubr.f32.vlgmr.msra.gmra.mxu0 %v230_v63  ;;  %917 = vmatprep.subr.mxu0 %v1021_v30 }
  0x52   :  { %949 = vmatprep.mubr.msk.f32.mxu0 %vm1022_vm0, %v1021_v30  ;;  %904 = vmatprep.subr.mxu1 %v1021_v30 }
  0x53   :  { %905 = vmatpush3.msra.mxu1 %v527_v11  ;;  %918 = vmatpush3.msra.mxu0 %v632_v16 }
  0x54   :  { %906 = vmatprep.subr.mxu1 %v1021_v30  ;;  %919 = vmatprep.subr.mxu0 %v1021_v30 }
  0x55   :  { %907 = vmatpush3.msra.mxu1 %v526_v12  ;;  %920 = vmatpush3.msra.mxu0 %v631_v17 }
  0x56   :  { %908 = vmatprep.subr.mxu1 %v1021_v30  ;;  %921 = vmatprep.subr.mxu0 %v1021_v30 }
  0x57   :  { %909 = vmatpush3.msra.mxu1 %v525_v13  ;;  %922 = vmatpush3.msra.mxu0 %v630_v18 }
  0x58   :  { %910 = vmatprep.subr.mxu1 %v1021_v30  ;;  %923 = vmatprep.subr.mxu0 %v1021_v30 }
  0x59   :  { %911 = vmatpush3.msra.mxu1 %v524_v14  ;;  %924 = vmatpush3.msra.mxu0 %v629_v19 }
  0x5a   :  { %912 = vmatprep.subr.mxu1 %v1021_v30  ;;  %925 = vmatprep.subr.mxu0 %v1021_v30 }
  0x5b   :  { %913 = vmatpush3.msra.mxu1 %v523_v15  ;;  %926 = vmatpush3.msra.mxu0 %v628_v20 }
  0x5c   :  { %927 = vmatprep.subr.mxu0 %v1021_v30 }
  0x5d   :  { %928 = vmatpush3.msra.mxu0 %v627_v21 }
  0x5e   :  { %929 = vmatprep.subr.mxu0 %v1021_v30 }
  0x5f   :  { %930 = vmatpush3.msra.mxu0 %v626_v22 }
  0x60   :  { %931 = vmatprep.subr.mxu0 %v1021_v30 }
  0x61   :  { %932 = vmatpush3.msra.mxu0 %v625_v23 }
  0x62   :  { %933 = vmatprep.subr.mxu0 %v1021_v30 }
  0x63   :  { %934 = vmatpush3.msra.mxu0 %v624_v24 }
  0x64   :  { %935 = vmatprep.subr.mxu0 %v1021_v30 }
  0x65   :  { %936 = vmatpush3.msra.mxu0 %v623_v25 }
  0x66   :  { %937 = vmatprep.subr.mxu0 %v1021_v30 }
  0x67   :  { %938 = vmatpush3.msra.mxu0 %v622_v26 }
  0x68   :  { %939 = vmatprep.subr.mxu0 %v1021_v30 }
  0x69   :  { %940 = vmatpush3.msra.mxu0 %v621_v27 }
  0x6a   :  { %941 = vmatprep.subr.mxu0 %v1021_v30 }
  0x6b   :  { %942 = vmatpush3.msra.mxu0 %v620_v28 }
  0x6c   :  { %943 = vmatprep.subr.mxu0 %v1021_v30 }
  0x6d   :  { %944 = vmatpush3.msra.mxu0 %v619_v47 }
  0x6e   :  { %945 = vmatprep.subr.mxu0 %v1021_v30 }
  0x6f   :  { %946 = vmatpush3.msra.mxu0 %v618_v48 }
  0x70   :  { %947 = vmatprep.subr.mxu0 %v1021_v30 }
  0x71   :  { %948 = vmatpush3.msra.mxu0 %v617_v49 }
  0xef   :  { %v765_v34 = vpop.f32.mrf.mxu0 }
  0xf1   :  { %v766_v35 = vpop.f32.mrf.mxu0 }
  0xf2   :  { %v800_v29 = vpop.f32.mrf.mxu1  ;;  %v767_v36 = vadd.f32 %v766_v35, %v765_v34 }
  0xf4   :  { %v801_v31 = vpop.f32.mrf.mxu1  ;;  %v309_v38 = vadd.f32 %v767_v36, %v729_v37 }
  0xf5   :  { %v802_v39 = vadd.f32 %v801_v31, %v800_v29 }
  0xf7   :  { %v379_v42 = vadd.f32 %v802_v39, %v309_v38 }
  0xfa   :  { %v518_v32 = vpop.f32.mrf.mxu1 }
  0xfc   :  { %v881_v33 = vpop.f32.mrf.mxu1 }
 0x111   :  { %v835_v40 = vpop.f32.mrf.mxu0 }
 0x113   :  { %v836_v41 = vpop.f32.mrf.mxu0 }
 0x114   :  { %v837_v43 = vadd.f32 %v836_v41, %v835_v40 }
 0x116   :  { %v449_v44 = vadd.f32 %v837_v43, %v379_v42 }
 0x118   :  { %v519_v45 = vadd.f32 %v518_v32, %v449_v44 }
 0x11a   :  { %v522_v46 = vmax.f32 %v519_v45, 0.0 }
 0x11c   :  { %915 = vmatmul.mubr.f32.vlgmr.msra.gmra.mxu1 %v522_v46 }
 0x1dc   :  { %v612_v51 = vpop.f32.mrf.mxu1 }
 0x1dd   :  { %v613_v52 = vadd.f32 %v731_v50, %v612_v51 }
 0x1de   :  { %v916_v53 = vpop.f32.mrf.mxu1 }
 0x1df   :  { %v616_v54 = vmax.f32 %v613_v52, 0.0 }
 0x1e1   :  { %950 = vmatmul.mubr.f32.vlgmr.msra.gmra.mxu0 %v616_v54 }
 0x2a1   :  { %v706_v56 = vpop.f32.mrf.mxu0 }
 0x2a2   :  { %v707_v30 = vadd.f32 %v732_v55, %v706_v56 }
 0x2a3   :  { %v951_v57 = vpop.f32.mrf.mxu0 }
 0x2a4   :  { %711 = vst.msk [vmem:[#allocation5] sm:$0xff] %vm710_vm2, %v707_v30 }
 0x2a5   :  { %716 = vsyncadd [#allocation4], 96  ;;  %s1023_s5 = smov [#allocation5]  }
 0x2a6   :  { %s717_s15 = sshll.u32 %s1023_s5, 4  ;;  %s718_s15 = int_to_ptr.vmem [resolvable:$true] %s717_s15 }
 0x2a7   :  { %s993_s16 = scalar_lea.vmem %s718_s15, 32  ;;  %s997_s4 = scalar_lea.vmem %s718_s15, 128 }
 0x2a8   :  { %p994_p5 = scmp.ne.s32.totalorder %s718_s15, %s993_s16  ;;  %p998_p6 = scmp.lt.s32.totalorder %s718_s15, %s718_s15 }
 0x2a9   :  { %p999_p7 = scmp.lt.s32.totalorder %s997_s4, %s993_s16 }
 0x2ab   :  { %p1000_p8 = por %p999_p7, %p998_p6 }
 0x2ad   :  { %p1001_p9 = pnand %p1000_p8, %p994_p5 }
 0x2af   :  { %1004 = shalt.err (!%p1001_p9)
}
 0x2b0   :  { %s1024_s17 = smov 32   ;;  %s1025_s18 = smov 2  }
 0x2b1   :  { %723 = dma.vmem_to_hbm [thread:$0]  %s718_s15, 32, %s1266_s7, [#allocation4], %s1024_s17, %s1024_s17, %s1025_s18  }
 0x2b2   :  { %1015 = dma.done.wait [#allocation4], 128  }
 0x2b3   :  { %1016 = vsyncadd [#allocation4], 4294967168 }
 0x2b4   :  { %727 = vsyncpa [#allocation3], 1 }
 0x2b5   :  { %728 = vsyncpa [#allocation4], 1 }

</bundles_post_ra>
